<compile_context>
chip_gen: v7x
topology: tpu7x:2x2x1
jax: 0.10.0
libtpu: 0.0.40
codegen_flags: <defaults>
</compile_context>

<pallas_src>
import functools

import jax
import jax.numpy as jnp
from jax import lax
from jax.experimental import pallas as pl
from jax.experimental.pallas import tpu as pltpu


def _round_up(x, m):
    return ((x + m - 1) // m) * m


def _conv_stats_kernel(p_ref, w_ref, y_ref, sum_ref, sq_ref):
    """One (batch, P-tile): conv GEMM + accumulated per-channel sum / sum-sq."""
    pt = pl.program_id(1)

    @pl.when(pt == 0)
    def _():
        sum_ref[...] = jnp.zeros_like(sum_ref)
        sq_ref[...] = jnp.zeros_like(sq_ref)

    # (Cout, K) @ (K, TP) -> (Cout, TP): bf16 operands, f32 MXU accumulation.
    y = jnp.dot(w_ref[...], p_ref[0], preferred_element_type=jnp.float32)

    # Single-pass stats (no 'centered' temporary, no extra slab traversal).
    sum_ref[0] += jnp.sum(y, axis=1, keepdims=True)      # (Cout, 1)
    sq_ref[0] += jnp.sum(y * y, axis=1, keepdims=True)   # (Cout, 1)

    # Lane-dense store: spatial positions on lanes, only real Cout channels.
    y_ref[0] = y.astype(y_ref.dtype)


def _norm_relu_kernel(y_ref, sum_ref, sq_ref, o_ref, *, inv_p, eps):
    """One (batch, P-tile): InstanceNorm (from accumulated stats) + ReLU."""
    y = y_ref[0]                                          # (Cout, TP) f32
    mean = sum_ref[0] * inv_p                             # (Cout, 1)
    var = sq_ref[0] * inv_p - mean * mean                 # E[y^2] - mean^2
    inv_std = lax.rsqrt(jnp.maximum(var, 0.0) + eps)      # clamp cancellation
    o_ref[0] = jnp.maximum((y - mean) * inv_std, 0.0).astype(o_ref.dtype)


def _im2col_kp(xpad, kh, kw, stride):
    """(N, C, Hp, Wp) -> (N, C*kh*kw, Hout*Wout); k index = c*kh*kw + i*kw + j.

    Note: emitted directly in (K, P) order — no extra materialized transpose.
    """
    N, C, Hp, Wp = xpad.shape
    Hout = (Hp - kh) // stride + 1
    Wout = (Wp - kw) // stride + 1
    cols = []
    for i in range(kh):
        for j in range(kw):
            cols.append(
                xpad[:, :,
                     i:i + (Hout - 1) * stride + 1:stride,
                     j:j + (Wout - 1) * stride + 1:stride])     # (N, C, Hout, Wout)
    patches = jnp.stack(cols, axis=2)                           # (N, C, kh*kw, Ho, Wo)
    patches = patches.reshape(N, C * kh * kw, Hout * Wout)      # (N, K, P)
    return patches, Hout, Wout


def relu_ins_conv2d(x, weight, bias=None, *, stride=1, padding=0, eps=1e-5):
    """Forward pass of ReLUINSConv2d.

    x:      (N, Cin, H, W)   float32, NCHW (like PyTorch)
    weight: (Cout, Cin, kh, kw)
    bias:   (Cout,) — accepted for API parity but unused: InstanceNorm's mean
            subtraction cancels a per-channel bias exactly.
    """
    del bias
    N, Cin, H, W = x.shape
    Cout, Cin_w, kh, kw = weight.shape
    assert Cin == Cin_w

    # ReflectionPad2d
    if padding > 0:
        x = jnp.pad(
            x, ((0, 0), (0, 0), (padding, padding), (padding, padding)),
            mode="reflect")

    # bf16 operands for the MXU (accumulation stays f32 in-kernel).
    patches, Hout, Wout = _im2col_kp(x.astype(jnp.bfloat16), kh, kw, stride)
    P = Hout * Wout
    K = Cin * kh * kw

    LANE = 128
    # P-tile: multiple of 128 lanes; capped so double-buffered tiles stay a few
    # MiB — comfortably inside v7x's 64 MiB VMEM and every scoped default.
    TP = min(1024, _round_up(P, LANE))
    P_pad = _round_up(P, TP)
    n_pt = P_pad // TP
    if P_pad != P:
        # Zero-padded positions produce y == 0 (no bias), contributing nothing
        # to sum / sum-of-squares; stats use the true 1/P, so they stay exact.
        patches = jnp.pad(patches, ((0, 0), (0, 0), (0, P_pad - P)))

    w2 = weight.reshape(Cout, K).astype(jnp.bfloat16)       # (Cout, K), unpadded

    f32 = jnp.float32
    vmem_cap = 48 * 1024 * 1024   # valid on v5e/v6e (128 MiB) and v7x (64 MiB)

    # ---- Pass 1: conv GEMM per P-tile + resident per-channel stat accumulators.
    y, s_sum, s_sq = pl.pallas_call(
        _conv_stats_kernel,
        out_shape=(jax.ShapeDtypeStruct((N, Cout, P_pad), f32),
                   jax.ShapeDtypeStruct((N, Cout, 1), f32),
                   jax.ShapeDtypeStruct((N, Cout, 1), f32)),
        grid_spec=pltpu.PrefetchScalarGridSpec(
            num_scalar_prefetch=0,
            grid=(N, n_pt),
            in_specs=[
                # Full-K block (legal: equals the array dim) — no HBM K padding.
                pl.BlockSpec((1, K, TP), lambda n, p: (n, 0, p)),
                # Constant index_map -> weight DMA'd once, resident in VMEM.
                pl.BlockSpec((Cout, K), lambda n, p: (0, 0)),
            ],
            out_specs=[
                pl.BlockSpec((1, Cout, TP), lambda n, p: (n, 0, p)),
                pl.BlockSpec((1, Cout, 1), lambda n, p: (n, 0, 0)),   # accumulator
                pl.BlockSpec((1, Cout, 1), lambda n, p: (n, 0, 0)),   # accumulator
            ],
        ),
        compiler_params=pltpu.CompilerParams(
            dimension_semantics=("parallel", "arbitrary"),   # stats reduce over P-tiles
            vmem_limit_bytes=vmem_cap),
    )(patches, w2)

    # ---- Pass 2: InstanceNorm (true-P stats) + ReLU, streamed per P-tile.
    norm_kernel = functools.partial(_norm_relu_kernel, inv_p=1.0 / P, eps=eps)
    out = pl.pallas_call(
        norm_kernel,
        out_shape=jax.ShapeDtypeStruct((N, Cout, P_pad), x.dtype),
        grid_spec=pltpu.PrefetchScalarGridSpec(
            num_scalar_prefetch=0,
            grid=(N, n_pt),
            in_specs=[
                pl.BlockSpec((1, Cout, TP), lambda n, p: (n, 0, p)),
                pl.BlockSpec((1, Cout, 1), lambda n, p: (n, 0, 0)),
                pl.BlockSpec((1, Cout, 1), lambda n, p: (n, 0, 0)),
            ],
            out_specs=pl.BlockSpec((1, Cout, TP), lambda n, p: (n, 0, p)),
        ),
        compiler_params=pltpu.CompilerParams(
            dimension_semantics=("parallel", "parallel"),
            vmem_limit_bytes=vmem_cap),
    )(y, s_sum, s_sq)

    if P_pad != P:
        out = out[:, :, :P]
    # Output is already channel-major: NCHW is a free reshape (no transpose).
    return out.reshape(N, Cout, Hout, Wout)


def _reference(x, weight, bias, *, stride, padding, eps=1e-5):
    """Pure-JAX reference of the PyTorch module (bias included; it cancels)."""
    if padding > 0:
        x = jnp.pad(
            x, ((0, 0), (0, 0), (padding, padding), (padding, padding)),
            mode="reflect")
    y = lax.conv_general_dilated(
        x, weight, window_strides=(stride, stride), padding="VALID",
        dimension_numbers=("NCHW", "OIHW", "NCHW"))
    y = y + bias.reshape(1, -1, 1, 1)
    mean = y.mean(axis=(2, 3), keepdims=True)
    var = y.var(axis=(2, 3), keepdims=True)            # biased, like InstanceNorm2d
    y = (y - mean) / jnp.sqrt(var + eps)
    return jnp.maximum(y, 0.0)


if __name__ == "__main__":
    key = jax.random.PRNGKey(0)
    kx, kw_, kb = jax.random.split(key, 3)

    # Small shapes consistent with the module: batch=2, n_in=4, n_out=8,
    # kernel_size=3, stride=1, padding=1, spatial 16x16.
    N, Cin, H, W = 2, 4, 16, 16
    Cout, ksz, stride, padding = 8, 3, 1, 1

    x = jax.random.normal(kx, (N, Cin, H, W), dtype=jnp.float32)
    # gaussian_weights_init: conv weights ~ N(0, 0.02)
    weight = 0.02 * jax.random.normal(kw_, (Cout, Cin, ksz, ksz), dtype=jnp.float32)
    bias = 0.1 * jax.random.normal(kb, (Cout,), dtype=jnp.float32)

    y = relu_ins_conv2d(x, weight, bias, stride=stride, padding=padding)
    jax.block_until_ready(y)

    y_ref = _reference(x, weight, bias, stride=stride, padding=padding)
    assert y.shape == y_ref.shape == (N, Cout, H, W)
    assert y.dtype == x.dtype
    max_err = float(jnp.max(jnp.abs(y - y_ref)))
    assert max_err < 5e-2, f"max abs error {max_err}"

    print("KERNEL_OK")
</pallas_src>

<mosaic_0001>
module attributes {stable_mosaic.version = 11 : i64} {
  func.func @_conv_stats_kernel(%arg0: i32, %arg1: i32, %arg2: memref<1x36x256xbf16, #tpu.memory_space<vmem>>, %arg3: memref<8x36xbf16, #tpu.memory_space<vmem>>, %arg4: memref<1x8x256xf32, #tpu.memory_space<vmem>>, %arg5: memref<1x8x1xf32, #tpu.memory_space<vmem>>, %arg6: memref<1x8x1xf32, #tpu.memory_space<vmem>>) attributes {dimension_semantics = [#tpu.dimension_semantics<parallel>, #tpu.dimension_semantics<arbitrary>], iteration_bounds = array<i64: 2, 1>, scalar_prefetch = 0 : i64, scratch_operands = 0 : i64, tpu.core_type = #tpu.core_type<tc>, window_params = [{transform_indices = @transform_0, window_bounds = array<i64: 1, 36, 256>}, {pipeline_mode = #tpu.pipeline_mode<synchronous>, transform_indices = @transform_1, window_bounds = array<i64: 8, 36>}, {transform_indices = @transform_2, window_bounds = array<i64: 1, 8, 256>}, {transform_indices = @transform_3, window_bounds = array<i64: 1, 8, 1>}, {transform_indices = @transform_4, window_bounds = array<i64: 1, 8, 1>}]} {
    %c0_i32 = arith.constant 0 : i32
    %0 = arith.cmpi eq, %arg1, %c0_i32 : i32
    %1 = arith.extui %0 : i1 to i32
    %c0_i32_0 = arith.constant 0 : i32
    %2 = arith.cmpi ne, %1, %c0_i32_0 : i32
    scf.if %2 {
      %cst_22 = arith.constant 0.000000e+00 : f32
      %27 = vector.broadcast %cst_22 : f32 to vector<1x8x1xf32>
      %c0_23 = arith.constant 0 : index
      %c0_24 = arith.constant 0 : index
      %c0_25 = arith.constant 0 : index
      %28 = vector.load %arg5[%c0_23, %c0_24, %c0_25] : memref<1x8x1xf32, #tpu.memory_space<vmem>>, vector<1x8x1xf32>
      tpu.vector_store %arg5[%c0_23, %c0_24, %c0_25], %27 {strides = array<i32>} : memref<1x8x1xf32, #tpu.memory_space<vmem>>, vector<1x8x1xf32>,
      %cst_26 = arith.constant 0.000000e+00 : f32
      %29 = vector.broadcast %cst_26 : f32 to vector<1x8x1xf32>
      %c0_27 = arith.constant 0 : index
      %c0_28 = arith.constant 0 : index
      %c0_29 = arith.constant 0 : index
      %30 = vector.load %arg6[%c0_27, %c0_28, %c0_29] : memref<1x8x1xf32, #tpu.memory_space<vmem>>, vector<1x8x1xf32>
      tpu.vector_store %arg6[%c0_27, %c0_28, %c0_29], %29 {strides = array<i32>} : memref<1x8x1xf32, #tpu.memory_space<vmem>>, vector<1x8x1xf32>,
    } else {
    }
    %c0 = arith.constant 0 : index
    %c0_1 = arith.constant 0 : index
    %3 = vector.load %arg3[%c0, %c0_1] : memref<8x36xbf16, #tpu.memory_space<vmem>>, vector<8x36xbf16>
    %c0_2 = arith.constant 0 : index
    %c0_3 = arith.constant 0 : index
    %c0_4 = arith.constant 0 : index
    %4 = vector.load %arg2[%c0_2, %c0_3, %c0_4] : memref<1x36x256xbf16, #tpu.memory_space<vmem>>, vector<1x36x256xbf16>
    %5 = vector.shape_cast %4 : vector<1x36x256xbf16> to vector<36x256xbf16>
    %cst = arith.constant dense<0.000000e+00> : vector<8x256xf32>
    %6 = tpu.matmul %3, %5, %cst {dimension_numbers = #tpu.dot_dimension_numbers<[1], [0], [0], [1], [0, 0, 1, 1], [], []>} : vector<8x36xbf16>, vector<36x256xbf16>, vector<8x256xf32> -> vector<8x256xf32>
    %c0_5 = arith.constant 0 : index
    %c0_6 = arith.constant 0 : index
    %c0_7 = arith.constant 0 : index
    %7 = vector.load %arg5[%c0_5, %c0_6, %c0_7] : memref<1x8x1xf32, #tpu.memory_space<vmem>>, vector<1x8x1xf32>
    %8 = vector.shape_cast %7 : vector<1x8x1xf32> to vector<8x1xf32>
    %cst_8 = arith.constant dense<0.000000e+00> : vector<8xf32>
    %9 = vector.multi_reduction <add>, %6, %cst_8 [1] : vector<8x256xf32> to vector<8xf32>
    %10 = vector.shape_cast %9 : vector<8xf32> to vector<8x1xf32>
    %11 = arith.addf %8, %10 : vector<8x1xf32>
    %c0_9 = arith.constant 0 : index
    %c0_10 = arith.constant 0 : index
    %c0_11 = arith.constant 0 : index
    %12 = vector.load %arg5[%c0_9, %c0_10, %c0_11] : memref<1x8x1xf32, #tpu.memory_space<vmem>>, vector<1x8x1xf32>
    %13 = vector.shape_cast %12 : vector<1x8x1xf32> to vector<8x1xf32>
    %14 = vector.shape_cast %11 : vector<8x1xf32> to vector<1x8x1xf32>
    tpu.vector_store %arg5[%c0_9, %c0_10, %c0_11], %14 {strides = array<i32>} : memref<1x8x1xf32, #tpu.memory_space<vmem>>, vector<1x8x1xf32>,
    %c0_12 = arith.constant 0 : index
    %c0_13 = arith.constant 0 : index
    %c0_14 = arith.constant 0 : index
    %15 = vector.load %arg6[%c0_12, %c0_13, %c0_14] : memref<1x8x1xf32, #tpu.memory_space<vmem>>, vector<1x8x1xf32>
    %16 = vector.shape_cast %15 : vector<1x8x1xf32> to vector<8x1xf32>
    %17 = arith.mulf %6, %6 : vector<8x256xf32>
    %cst_15 = arith.constant dense<0.000000e+00> : vector<8xf32>
    %18 = vector.multi_reduction <add>, %17, %cst_15 [1] : vector<8x256xf32> to vector<8xf32>
    %19 = vector.shape_cast %18 : vector<8xf32> to vector<8x1xf32>
    %20 = arith.addf %16, %19 : vector<8x1xf32>
    %c0_16 = arith.constant 0 : index
    %c0_17 = arith.constant 0 : index
    %c0_18 = arith.constant 0 : index
    %21 = vector.load %arg6[%c0_16, %c0_17, %c0_18] : memref<1x8x1xf32, #tpu.memory_space<vmem>>, vector<1x8x1xf32>
    %22 = vector.shape_cast %21 : vector<1x8x1xf32> to vector<8x1xf32>
    %23 = vector.shape_cast %20 : vector<8x1xf32> to vector<1x8x1xf32>
    tpu.vector_store %arg6[%c0_16, %c0_17, %c0_18], %23 {strides = array<i32>} : memref<1x8x1xf32, #tpu.memory_space<vmem>>, vector<1x8x1xf32>,
    %c0_19 = arith.constant 0 : index
    %c0_20 = arith.constant 0 : index
    %c0_21 = arith.constant 0 : index
    %24 = vector.load %arg4[%c0_19, %c0_20, %c0_21] : memref<1x8x256xf32, #tpu.memory_space<vmem>>, vector<1x8x256xf32>
    %25 = vector.shape_cast %24 : vector<1x8x256xf32> to vector<8x256xf32>
    %26 = vector.shape_cast %6 : vector<8x256xf32> to vector<1x8x256xf32>
    tpu.vector_store %arg4[%c0_19, %c0_20, %c0_21], %26 {strides = array<i32>} : memref<1x8x256xf32, #tpu.memory_space<vmem>>, vector<1x8x256xf32>,
    return
  }
  func.func @transform_0(%arg0: i32, %arg1: i32) -> (i32, i32, i32) {
    %c0_i32 = arith.constant 0 : i32
    %c0_i32_0 = arith.constant 0 : i32
    return %arg0, %c0_i32, %arg1 : i32, i32, i32
  }
  func.func @transform_1(%arg0: i32, %arg1: i32) -> (i32, i32) {
    %c0_i32 = arith.constant 0 : i32
    %c0_i32_0 = arith.constant 0 : i32
    %c0_i32_1 = arith.constant 0 : i32
    return %c0_i32, %c0_i32_0 : i32, i32
  }
  func.func @transform_2(%arg0: i32, %arg1: i32) -> (i32, i32, i32) {
    %c0_i32 = arith.constant 0 : i32
    %c0_i32_0 = arith.constant 0 : i32
    return %arg0, %c0_i32, %arg1 : i32, i32, i32
  }
  func.func @transform_3(%arg0: i32, %arg1: i32) -> (i32, i32, i32) {
    %c0_i32 = arith.constant 0 : i32
    %c0_i32_0 = arith.constant 0 : i32
    %c0_i32_1 = arith.constant 0 : i32
    return %arg0, %c0_i32, %c0_i32_0 : i32, i32, i32
  }
  func.func @transform_4(%arg0: i32, %arg1: i32) -> (i32, i32, i32) {
    %c0_i32 = arith.constant 0 : i32
    %c0_i32_0 = arith.constant 0 : i32
    %c0_i32_1 = arith.constant 0 : i32
    return %arg0, %c0_i32, %c0_i32_0 : i32, i32, i32
  }
}

</mosaic_0001>

<bundles_post_ra>
// kernel: tpu_custom_call.1
= control target key start
LH: loop header
LB: loop body
LE: loop exit
PB: predicated region body
PF: predicated region fallthrough
CT: control target
= control target key end

     0   :  { %10 = vsyncpa [#allocation3], 0  ;;  %s841_s0 = inlined_call_operand.vmem [shape: bf16[2,36,256], index: 0, kind: input, shape index: {}]   ;;  %s842_s1 = inlined_call_operand.vmem [shape: bf16[8,36], index: 1, kind: input, shape index: {}]   ;;  %s843_s2 = inlined_call_operand.hbm [shape: f32[2,8,256], index: 2, kind: output, shape index: {0}]   ;;  %s844_s3 = inlined_call_operand.vmem [shape: f32[2,8,1], index: 3, kind: output, shape index: {1}]   ;;  %s845_s4 = inlined_call_operand.vmem [shape: f32[2,8,1], index: 4, kind: output, shape index: {2}]  }
   0x1   :  { %12 = vsyncpa [#allocation3 + $0x1], 0  ;;  %s708_s15 = smov 0   ;;  %s710_s16 = smov 0  }
   0x2   :  { %s712_s17 = smov 0   ;;  %s714_s18 = smov 0  }
   0x3   :  { %s716_s19 = smov 0   ;;  %s718_s20 = smov 0  }
   0x4 LB: > { %s511_s21 = sadd.s32 4294967295, %s678_s20   ;;  %s512_s22 = sadd.s32 4294967294, %s678_s20   ;;  %s678_s20 = sphi %s718_s20, %s18_s20   ;;  %s674_s19 = sphi %s716_s19, %s852_s19   ;;  %s670_s18 = sphi %s714_s18, %s851_s18   ;;  %s666_s17 = sphi %s712_s17, %s850_s17   ;;  %s662_s16 = sphi %s710_s16, %s849_s16   ;;  %s658_s15 = sphi %s708_s15, %s848_s15  }
   0x5   : > { %s30_s23 = sadd.s32 1, %s674_s19  ;;  %s88_s24 = sadd.s32 1, %s666_s17 }
   0x6   : > { %p32_p0 = scmp.ge.s32.totalorder %s30_s23, 2  ;;  %p98_p1 = scmp.ne.s32.totalorder %s666_s17, %s662_s16 }
   0x7   : > { %p99_p2 = scmp.eq.s32.totalorder %s511_s21, 1  ;;  %p104_p3 = scmp.ne.s32.totalorder %s662_s16, %s658_s15 }
   0x8   : > { %s854_s23 = smov (%p32_p0, %s30_s23), 0  ;;  %p105_p5 = scmp.eq.s32.totalorder %s512_s22, 1 }
   0x9   : > { %p748_p4 = por %p99_p2, %p98_p1  ;;  %s83_s26 = ssub.s32 %s674_s19, %s854_s23 }
   0xa   : > { %p515_p6 = scmp.ge.s32.totalorder %s678_s20, 1  ;;  %p86_p7 = scmp.eq.s32.totalorder %s83_s26, 0 }
   0xb   : > { %p755_p8 = por %p105_p5, %p104_p3  ;;  %p191_p9 = scmp.lt.s32.totalorder %s678_s20, 3 }
   0xc   : > { %s761_s28 = scalar_select %p86_p7, %s666_s17, %s88_s24  }
   0xd   : > { %p192_p10 = pnand %p515_p6, %p191_p9 }
   0xe   : > { %p230_p11 = scmp.lt.s32.totalorder (!%p192_p10), %s670_s18, 1  ;;  %v680_v0 = vmov (!%p192_p10), 0   ;;  %vm291_vm0 = vcmask (!%p192_p10), 1041408   ;;  %v256_v9 = vld [vmem:[%s842_s1] sm:$0xf] (!%p192_p10)  ;;  %vm287_vm1 = vcmask (!%p192_p10), 293888  }
   0xf   : > { %195 = sbr.rel (%p192_p10) target bundleno = 404 (0x194), region = 28  ;;  %330 = vmatprep.mubr.bf16.mxu0 (!%p192_p10), %v680_v0  ;;  %vm253_vm2 = vcmask (!%p192_p10), 7168   ;;  %v681_v10 = vmov (!%p192_p10), 0.0   ;;  %s214_s14 = sand.u32 (!%p192_p10), 1, %s662_s16  }
  0x10   : > { %s516_s21 = sshll.u32 (!%p192_p10), %s214_s14, 4  ;;  %s357_s9 = scalar_lea.sflag (!%p192_p10), [#allocation3], %s214_s14 }
  0x11   : > { %s216_s22 = scalar_lea.vmem (!%p192_p10), [#allocation2], %s516_s21  ;;  %s682_s12 = smov (!%p192_p10), [#allocation2]  }
  0x12   : > { %s381_s5 = sshll.u32 (!%p192_p10), %s216_s22, 4  ;;  %s382_s5 = int_to_ptr.vmem [resolvable:$true] %s381_s5 }
  0x13   : > { %s600_s11 = scalar_lea.vmem (!%p192_p10), %s382_s5, 256 }
  0x14   : > { %p601_p12 = scmp.ne.s32.totalorder (!%p192_p10), %s382_s5, %s600_s11 }
  0x16   : > { %s765_s29 = scalar_select %p230_p11, %s670_s18, 1 }
  0x17   : > { %p602_p13 = pnand %p601_p12, %p748_p4 }
  0x18   : > { %s534_s30 = smul.u32 40, %s765_s29  ;;  %s518_s10 = sshll.u32 %s765_s29, 3 }
  0x19   : > { %s778_s13 = scalar_lea.vmem %s844_s3, %s518_s10  ;;  %s786_s29 = scalar_lea.vmem %s845_s4, %s518_s10 }
  0x1a   : > { %s237_s7 = scalar_lea.vmem %s841_s0, %s534_s30  ;;  %254 = vst.msk [vmem:[%s778_s13] sm:$0xff] %vm253_vm2, %v681_v10  ;;  %255 = vst.msk [vmem:[%s786_s29] sm:$0xff] %vm253_vm2, %v681_v10  ;;  %s533_s30 = sshll.u32 %s670_s18, 8 }
  0x1b   : > { %v592_v1 = vld [vmem:[%s237_s7 + $0x4] ss:$8 sps:$4 sm:$0xff]   ;;  %v594_v2 = vld [vmem:[%s237_s7] ss:$8 sps:$4 sm:$0xff]   ;;  %v595_v3 = vld [vmem:[%s237_s7 + $0x14] ss:$8 sps:$4 sm:$0xff]   ;;  %s794_s8 = scalar_lea.hbm %s843_s2, %s533_s30  ;;  %p603_p0 = pneg %p602_p13 }
  0x1c   : > { %298 = vmatprep.subr.bf16.mxu0 %v592_v1  ;;  %v261_v4 = vld [vmem:[%s237_s7 + $0x20] sm:$0x33]  ;;  %v597_v5 = vld [vmem:[%s237_s7 + $0x10] ss:$8 sps:$4 sm:$0xff]   ;;  %s604_s10 = sshll.u32 %s682_s12, 4  ;;  %s605_s10 = int_to_ptr.vmem [resolvable:$false] %s604_s10 }
  0x1d   : > { %299 = vmatpush1.bf16.msra.mxu0 %v594_v2  ;;  %v525_v6 = vcombine.high %v261_v4, %v261_v4  ;;  %v524_v7 = vcombine.low %v261_v4, %v261_v4  ;;  %s606_s21 = scalar_lea.vmem %s605_s10, 512  ;;  %p607_p1 = scmp.lt.s32.totalorder %s382_s5, %s605_s10 }
  0x1e   : > { %300 = vmatprep.subr.bf16.mxu0 %v595_v3  ;;  %p608_p2 = scmp.lt.s32.totalorder %s606_s21, %s600_s11 }
  0x1f   : > { %v293_v8 = vsel %vm291_vm0, %v524_v7, 0 }
  0x20   : > { %p609_p3 = por %p608_p2, %p607_p1 }
  0x21   : > { %301 = vmatpush1.bf16.msra.mxu0 %v597_v5 }
  0x22   : > { %526 = vmatprep.subr.msk.bf16.mxu0 %vm291_vm0, %v525_v6  ;;  %p610_p5 = pnand %p609_p3, %p603_p0 }
  0x25   : > { %303 = vmatpush1.bf16.msra.mxu0 %v293_v8 }
  0x28   : > { %527 = vmatmul.mubr.msk.bf16.vlgmr.msra.gmra.mrb[0].mxu0 %vm287_vm1, %v256_v9 }
  0xfb   : > { %v332_v11 = vpop.f32.mrb[0].mxu0 }
  0xfc   : > { %354 = vst [vmem:[%s216_s22] sm:$0xff] %v332_v11  ;;  %v334_v12 = vpop.f32.mrb[1].mxu0  ;;  %v347_v13 = vmul.f32 %v332_v11, %v332_v11 }
  0xfd   : > { %355 = vst [vmem:[%s216_s22 + $0x8] sm:$0xff] %v334_v12  ;;  %v336_v14 = vpop.f32.mrb[2].mxu0  ;;  %v340_v15 = vadd.f32 %v334_v12, %v332_v11  ;;  %v348_v16 = vmul.f32 %v334_v12, %v334_v12 }
  0xfe   : > { %v337_v17 = vpop.f32.mrb[3].mxu0 }
  0xff   : > { %341 = vadd.xlane.f32.xlu0 %v340_v15  ;;  %v349_v18 = vadd.f32 %v348_v16, %v347_v13 }
 0x103   : > { %350 = vadd.xlane.f32.xlu0 %v349_v18 }
 0x104   : > { %613 = shalt.err (!%p610_p5)
}
 0x105   : > { %s614_s18 = scalar_lea.hbm %s794_s8, 256  ;;  %s618_s24 = scalar_lea.hbm %s843_s2, 512 }
 0x106   : > { %p615_p6 = scmp.ne.s32.totalorder %s794_s8, %s614_s18  ;;  %p619_p10 = scmp.lt.u32.totalorder %s794_s8, %s843_s2 }
 0x107   : > { %p620_p11 = scmp.lt.u32.totalorder %s618_s24, %s614_s18  ;;  %p622_p13 = scmp.lt.u32.totalorder %s614_s18, %s794_s8 }
 0x108   : > { %p616_p7 = pnand %p615_p6, %p748_p4 }
 0x109   : > { %p621_p12 = por %p620_p11, %p619_p10 }
 0x10a   : > { %p617_p9 = pneg %p616_p7 }
 0x10b   : > { %p623_p0 = por %p622_p13, %p621_p12 }
 0x10d   : > { %p624_p1 = pnand %p623_p0, %p617_p9 }
 0x10f   : > { %627 = shalt.err (!%p624_p1)
}
 0x110   : > { %535 = dma.vmem_to_hbm [thread:$0]  (%p748_p4), %s382_s5, 256, %s794_s8, %s357_s9   ;;  %v339_v19 = vld [vmem:[%s778_s13] sm:$0xff] }
 0x111   : > { %v346_v22 = vld [vmem:[%s786_s29] sm:$0xff] }
 0x18c   : > { %v342_v20 = vpop.xlane.xlu0 %341 }
 0x18d   : > { %v343_v21 = vadd.f32 %v342_v20, %v339_v19 }
 0x18f   : > { %345 = vst.msk [vmem:[%s778_s13] sm:$0xff] %vm253_vm2, %v343_v21 }
 0x190   : > { %v351_v23 = vpop.xlane.xlu0 %350 }
 0x191   : > { %v352_v24 = vadd.f32 %v351_v23, %v346_v22 }
 0x193   : > { %353 = vst.msk [vmem:[%s786_s29] sm:$0xff] %vm253_vm2, %v352_v24 }
 0x194 PF: > { %p541_p2 = scmp.ge.s32.totalorder %s678_s20, 2  ;;  %s399_s25 = sand.u32 1, %s658_s15  }
 0x195   : > { %s400_s6 = scalar_lea.sflag [#allocation3], %s399_s25 }
 0x196   : > { %p538_p3 = pnand %p541_p2, %p755_p8 }
 0x198   : > { %653 = dma.done.wait (!%p538_p3), %s400_s6, 256  }
 0x199   : > { %655 = vsyncadd (!%p538_p3), %s400_s6, 4294967040  ;;  %s18_s20 = sadd.s32 1, %s678_s20   ;;  %s848_s15 = smov %s662_s16 }
 0x19a   : > { %p15_p4 = scmp.ge.s32.totalorder %s18_s20, 4   ;;  %s849_s16 = smov %s666_s17 }
 0x19b   : > { %s850_s17 = smov %s761_s28  ;;  %s851_s18 = smov %s674_s19 }
 0x19c   : > { %s852_s19 = smov %s854_s23  ;;  %17 = sbr.rel (!%p15_p4) target bundleno = 4 (0x4), region = 91 }
 0x1a3   :  { %419 = vsyncpa [#allocation3], 1 }
 0x1a4   :  { %421 = vsyncpa [#allocation3 + $0x1], 1 }

</bundles_post_ra>
